<compile_context>
chip_gen: v6e
topology: v6e:2x2x1
jax: 0.10.0
libtpu: 0.0.40
codegen_flags: <defaults>
</compile_context>

<pallas_src>
from functools import partial

import jax
import jax.numpy as jnp
from jax.experimental import pallas as pl
from jax.experimental.pallas import tpu as pltpu


# ----------------------------- Pallas kernel ------------------------------- #
def _sep_temporal_kernel(x_ref, weT_ref, be_ref, wdT_ref, bd_ref, wpT_ref, bp_ref,
                         mask_ref, o_ref, *, V, K):
    # Per grid step (one sample, N axis squeezed):
    #   x_ref  : (C, TV)  f32, lane index = t*V + v
    #   weT_ref: (IC, C)  bf16   be_ref: (IC, 1) f32   expand 1x1 conv (BN folded)
    #   wdT_ref: (IC, K)  f32    bd_ref: (IC, 1) f32   depthwise temporal conv
    #   wpT_ref: (C, IC)  bf16   bp_ref: (C, 1)  f32   point 1x1 conv (BN folded)
    #   mask_ref: (K, TV) f32    per-tap "same"-padding validity masks
    #   o_ref  : (C, TV)  f32
    TV = x_ref.shape[-1]
    pad = (K - 1) // 2

    # --- expand 1x1 conv + BN + ReLU: bf16 MXU operands, f32 accumulate ----- #
    y = jnp.dot(weT_ref[...], x_ref[...].astype(jnp.bfloat16),
                preferred_element_type=jnp.float32)           # (IC, TV) f32
    y = jnp.maximum(y + be_ref[...], 0.0)

    # --- depthwise (K x 1) temporal conv, same padding, stride 1, BN, ReLU -- #
    # out[t] = sum_k w[k] * y[t + k - pad]; a temporal shift of s frames is a
    # lane shift of s*V.  Off-center taps are pltpu.roll (XLU) multiplied by a
    # precomputed per-lane edge mask (no iota / where in the kernel).
    wdT = wdT_ref[...]                                        # (IC, K) f32
    acc = y * wdT[:, pad:pad + 1]                             # center tap
    for k in range(K):                                        # static unroll, K small
        if k == pad:
            continue
        sv = ((pad - k) * V) % TV                             # static lane shift
        rolled = pltpu.roll(y, shift=sv, axis=1)              # rolled[l] = y[l - sv]
        acc = acc + (rolled * mask_ref[k:k + 1, :]) * wdT[:, k:k + 1]
    acc = jnp.maximum(acc + bd_ref[...], 0.0)                 # (IC, TV) f32

    # --- point 1x1 conv + BN (no act), residual add, final ReLU ------------ #
    z = jnp.dot(wpT_ref[...], acc.astype(jnp.bfloat16),
                preferred_element_type=jnp.float32) + bp_ref[...]
    # dropT is identity (keep_prob=1); residual is identity (stride=1).
    # x_ref is re-read here (instead of holding the f32 tile live across the
    # whole body) to keep its live range short.
    o_ref[...] = jnp.maximum(z + x_ref[...], 0.0)             # (C, TV) full-width store


def sep_temporal_block(x_nctv, we, be, wd, bd, wp, bp):
    """x_nctv: (N, C, T, V) float32 (PyTorch NCHW layout).  Returns same layout.

    we: (C, IC)  be: (IC,)   expand 1x1 conv (BN folded)
    wd: (K, IC)  bd: (IC,)   depthwise (K,1) temporal conv (BN folded)
    wp: (IC, C)  bp: (C,)    point 1x1 conv (BN folded)
    """
    N, C, T, V = x_nctv.shape
    IC = we.shape[1]
    K = wd.shape[0]
    pad = (K - 1) // 2
    TV = T * V

    # Free reshape (no data movement): per-sample tiles are already channel-major
    # with a lane-dense T*V minor axis in the NCTV layout.
    x_ncl = x_nctv.reshape(N, C, TV)

    # In a real network these would be stored pre-transposed / pre-cast once;
    # here they are tiny and folded under jit.
    weT = we.T.astype(jnp.bfloat16)                           # (IC, C)  MXU operand
    wpT = wp.T.astype(jnp.bfloat16)                           # (C, IC)  MXU operand
    wdT = wd.T                                                # (IC, K)  f32 (VPU)
    be2 = be.reshape(IC, 1)
    bd2 = bd.reshape(IC, 1)
    bp2 = bp.reshape(C, 1)

    # Per-tap "same"-padding masks, identical for every sample: mask[k, t*V+v]=1
    # iff the source frame t + k - pad lies inside [0, T).
    t_of_lane = jnp.arange(TV, dtype=jnp.int32) // V
    src_t = t_of_lane[None, :] + jnp.arange(K, dtype=jnp.int32)[:, None] - pad
    masks = ((src_t >= 0) & (src_t < T)).astype(jnp.float32)  # (K, TV)

    kernel = partial(_sep_temporal_kernel, V=V, K=K)

    per_sample = lambda: pl.BlockSpec((None, C, TV), lambda n: (n, 0, 0))
    resident = pl.BlockSpec(memory_space=pltpu.MemorySpace.VMEM)  # whole array, loaded once

    flops = 2 * N * TV * (C * IC + IC * K + IC * C) + 6 * N * TV * (IC + C)
    bytes_accessed = (4 * (2 * x_ncl.size + wdT.size + be2.size + bd2.size
                           + bp2.size + masks.size)
                      + 2 * (weT.size + wpT.size))

    out = pl.pallas_call(
        kernel,
        out_shape=jax.ShapeDtypeStruct((N, C, TV), jnp.float32),
        grid=(N,),
        in_specs=[per_sample(),                               # x: one sample per step
                  resident, resident,                         # weT, be
                  resident, resident,                         # wdT, bd
                  resident, resident,                         # wpT, bp
                  resident],                                  # masks
        out_specs=per_sample(),
        compiler_params=pltpu.CompilerParams(
            dimension_semantics=("parallel",),                # megacore on v7x, free elsewhere
            vmem_limit_bytes=32 * 1024 * 1024),
        cost_estimate=pl.CostEstimate(flops=flops, transcendentals=0,
                                      bytes_accessed=bytes_accessed),
        # TODO(synk): once the layout is shared across consecutive blocks,
        # input_output_aliases={0: 0} saves the output HBM allocation.
    )(x_ncl, weT, be2, wdT, bd2, wpT, bp2, masks)

    return out.reshape(N, C, T, V)                            # free reshape


# --------------------------- parameter helpers ------------------------------ #
def fold_bn(w, b, gamma, beta, mean, var, eps=1e-5):
    """Fold eval-mode BatchNorm into a conv whose out-channels are on w's LAST axis."""
    s = gamma / jnp.sqrt(var + eps)
    return w * s[None, :], (b - mean) * s + beta


# ----------------------------- pure-JAX reference --------------------------- #
def reference(x_nctv, we, be, wd, bd, wp, bp):
    """Same math, same mixed precision (bf16 MXU operands, f32 accumulate)."""
    x = jnp.transpose(x_nctv, (0, 2, 3, 1))                   # (N, T, V, C)
    N, T, V, C = x.shape
    K = wd.shape[0]
    pad = (K - 1) // 2
    y = jnp.einsum('ntvc,ci->ntvi',
                   x.astype(jnp.bfloat16), we.astype(jnp.bfloat16),
                   preferred_element_type=jnp.float32)
    y = jnp.maximum(y + be, 0.0)
    yp = jnp.pad(y, ((0, 0), (pad, pad), (0, 0), (0, 0)))
    acc = jnp.zeros_like(y)
    for k in range(K):
        acc = acc + yp[:, k:k + T] * wd[k][None, None, None, :]
    acc = jnp.maximum(acc + bd, 0.0)
    z = jnp.einsum('ntvi,ic->ntvc',
                   acc.astype(jnp.bfloat16), wp.astype(jnp.bfloat16),
                   preferred_element_type=jnp.float32) + bp
    out = jnp.maximum(z + x, 0.0)
    return jnp.transpose(out, (0, 3, 1, 2))                   # (N, C, T, V)


# ----------------------------------- main ----------------------------------- #
if __name__ == "__main__":
    # Small shapes consistent with the module: N=2, C=4, T=16, V=16.
    # (Perf decisions above target production C/IC >= 128, T*V >= 2048; at this
    #  toy size everything is launch-overhead bound.)
    N, C, T, V = 2, 4, 16, 16
    temporal_window_size = 3
    expand_ratio = 2
    IC = C * expand_ratio
    K = temporal_window_size

    key = jax.random.PRNGKey(0)
    ks = jax.random.split(key, 16)

    x = jax.random.normal(ks[0], (N, C, T, V), dtype=jnp.float32)   # PyTorch NCHW

    # expand conv (1x1): weight (C, IC), bias (IC,) + BN params
    we_raw = 0.3 * jax.random.normal(ks[1], (C, IC), jnp.float32)
    be_raw = 0.1 * jax.random.normal(ks[2], (IC,), jnp.float32)
    g_e = 1.0 + 0.1 * jax.random.normal(ks[3], (IC,), jnp.float32)
    b_e = 0.1 * jax.random.normal(ks[4], (IC,), jnp.float32)
    m_e = 0.1 * jax.random.normal(ks[5], (IC,), jnp.float32)
    v_e = jax.random.uniform(ks[6], (IC,), jnp.float32, 0.5, 1.5)

    # depthwise temporal conv: weight (K, IC), bias (IC,) + BN params
    wd_raw = 0.3 * jax.random.normal(ks[7], (K, IC), jnp.float32)
    bd_raw = 0.1 * jax.random.normal(ks[8], (IC,), jnp.float32)
    g_d = 1.0 + 0.1 * jax.random.normal(ks[9], (IC,), jnp.float32)
    b_d = 0.1 * jax.random.normal(ks[10], (IC,), jnp.float32)
    m_d = 0.1 * jax.random.normal(ks[11], (IC,), jnp.float32)
    v_d = jax.random.uniform(ks[12], (IC,), jnp.float32, 0.5, 1.5)

    # point conv (1x1): weight (IC, C), bias (C,) + BN params
    wp_raw = 0.3 * jax.random.normal(ks[13], (IC, C), jnp.float32)
    bp_raw = 0.1 * jax.random.normal(ks[14], (C,), jnp.float32)
    g_p = 1.0 + 0.1 * jax.random.normal(ks[15], (C,), jnp.float32)
    b_p = jnp.zeros((C,), jnp.float32)
    m_p = jnp.zeros((C,), jnp.float32)
    v_p = jnp.ones((C,), jnp.float32)

    # Fold BatchNorm (eval mode) into conv weights/biases.
    we, be = fold_bn(we_raw, be_raw, g_e, b_e, m_e, v_e)
    wd, bd = fold_bn(wd_raw, bd_raw, g_d, b_d, m_d, v_d)
    wp, bp = fold_bn(wp_raw, bp_raw, g_p, b_p, m_p, v_p)

    out = jax.jit(sep_temporal_block)(x, we, be, wd, bd, wp, bp)
    out = jax.block_until_ready(out)

    # Verify against a pure-JAX reference of the same math / precision.
    ref = jax.block_until_ready(reference(x, we, be, wd, bd, wp, bp))
    max_err = float(jnp.max(jnp.abs(out - ref)))
    if max_err < 2e-3:
        print("KERNEL_OK")
    else:
        print(f"MISMATCH max_err={max_err}")
</pallas_src>

<mosaic_0001>
module attributes {stable_mosaic.version = 11 : i64} {
  func.func @_sep_temporal_kernel(%arg0: i32, %arg1: memref<1x4x256xf32, #tpu.memory_space<vmem>>, %arg2: memref<8x4xbf16, #tpu.memory_space<vmem>>, %arg3: memref<8x1xf32, #tpu.memory_space<vmem>>, %arg4: memref<8x3xf32, #tpu.memory_space<vmem>>, %arg5: memref<8x1xf32, #tpu.memory_space<vmem>>, %arg6: memref<4x8xbf16, #tpu.memory_space<vmem>>, %arg7: memref<4x1xf32, #tpu.memory_space<vmem>>, %arg8: memref<3x256xf32, #tpu.memory_space<vmem>>, %arg9: memref<1x4x256xf32, #tpu.memory_space<vmem>>) attributes {dimension_semantics = [#tpu.dimension_semantics<parallel>], iteration_bounds = array<i64: 2>, scalar_prefetch = 0 : i64, scratch_operands = 0 : i64, tpu.core_type = #tpu.core_type<tc>, window_params = [{transform_indices = @transform_0, window_bounds = array<i64: 1, 4, 256>}, {pipeline_mode = #tpu.pipeline_mode<synchronous>, transform_indices = @transform_1, window_bounds = array<i64: 8, 4>}, {pipeline_mode = #tpu.pipeline_mode<synchronous>, transform_indices = @transform_2, window_bounds = array<i64: 8, 1>}, {pipeline_mode = #tpu.pipeline_mode<synchronous>, transform_indices = @transform_3, window_bounds = array<i64: 8, 3>}, {pipeline_mode = #tpu.pipeline_mode<synchronous>, transform_indices = @transform_4, window_bounds = array<i64: 8, 1>}, {pipeline_mode = #tpu.pipeline_mode<synchronous>, transform_indices = @transform_5, window_bounds = array<i64: 4, 8>}, {pipeline_mode = #tpu.pipeline_mode<synchronous>, transform_indices = @transform_6, window_bounds = array<i64: 4, 1>}, {pipeline_mode = #tpu.pipeline_mode<synchronous>, transform_indices = @transform_7, window_bounds = array<i64: 3, 256>}, {transform_indices = @transform_8, window_bounds = array<i64: 1, 4, 256>}]} {
    %c0 = arith.constant 0 : index
    %c0_0 = arith.constant 0 : index
    %0 = vector.load %arg2[%c0, %c0_0] : memref<8x4xbf16, #tpu.memory_space<vmem>>, vector<8x4xbf16>
    %c0_1 = arith.constant 0 : index
    %c0_2 = arith.constant 0 : index
    %c0_3 = arith.constant 0 : index
    %1 = vector.load %arg1[%c0_1, %c0_2, %c0_3] : memref<1x4x256xf32, #tpu.memory_space<vmem>>, vector<1x4x256xf32>
    %2 = vector.shape_cast %1 : vector<1x4x256xf32> to vector<4x256xf32>
    %3 = arith.truncf %2 : vector<4x256xf32> to vector<4x256xbf16>
    %cst = arith.constant dense<0.000000e+00> : vector<8x256xf32>
    %4 = tpu.matmul %0, %3, %cst {dimension_numbers = #tpu.dot_dimension_numbers<[1], [0], [0], [1], [0, 0, 1, 1], [], []>} : vector<8x4xbf16>, vector<4x256xbf16>, vector<8x256xf32> -> vector<8x256xf32>
    %c0_4 = arith.constant 0 : index
    %c0_5 = arith.constant 0 : index
    %5 = vector.load %arg3[%c0_4, %c0_5] : memref<8x1xf32, #tpu.memory_space<vmem>>, vector<8x1xf32>
    %6 = vector.broadcast %5 : vector<8x1xf32> to vector<8x256xf32>
    %7 = arith.addf %4, %6 : vector<8x256xf32>
    %cst_6 = arith.constant 0.000000e+00 : f32
    %8 = vector.broadcast %cst_6 : f32 to vector<8x256xf32>
    %9 = arith.maximumf %7, %8 : vector<8x256xf32>
    %c0_7 = arith.constant 0 : index
    %c0_8 = arith.constant 0 : index
    %10 = vector.load %arg4[%c0_7, %c0_8] : memref<8x3xf32, #tpu.memory_space<vmem>>, vector<8x3xf32>
    %11 = vector.extract_strided_slice %10 {offsets = [0, 1], sizes = [8, 1], strides = [1, 1]} : vector<8x3xf32> to vector<8x1xf32>
    %12 = vector.broadcast %11 : vector<8x1xf32> to vector<8x256xf32>
    %13 = arith.mulf %9, %12 : vector<8x256xf32>
    %c16_i32 = arith.constant 16 : i32
    %14 = tpu.dynamic_rotate %9 by %c16_i32 dim 1 : vector<8x256xf32>, i32 -> vector<8x256xf32>
    %c0_9 = arith.constant 0 : index
    %c0_10 = arith.constant 0 : index
    %15 = vector.load %arg8[%c0_9, %c0_10] : memref<3x256xf32, #tpu.memory_space<vmem>>, vector<1x256xf32>
    %16 = vector.broadcast %15 : vector<1x256xf32> to vector<8x256xf32>
    %17 = arith.mulf %14, %16 : vector<8x256xf32>
    %18 = vector.extract_strided_slice %10 {offsets = [0, 0], sizes = [8, 1], strides = [1, 1]} : vector<8x3xf32> to vector<8x1xf32>
    %19 = vector.broadcast %18 : vector<8x1xf32> to vector<8x256xf32>
    %20 = arith.mulf %17, %19 : vector<8x256xf32>
    %21 = arith.addf %13, %20 : vector<8x256xf32>
    %c240_i32 = arith.constant 240 : i32
    %22 = tpu.dynamic_rotate %9 by %c240_i32 dim 1 : vector<8x256xf32>, i32 -> vector<8x256xf32>
    %c2 = arith.constant 2 : index
    %c0_11 = arith.constant 0 : index
    %23 = vector.load %arg8[%c2, %c0_11] : memref<3x256xf32, #tpu.memory_space<vmem>>, vector<1x256xf32>
    %24 = vector.broadcast %23 : vector<1x256xf32> to vector<8x256xf32>
    %25 = arith.mulf %22, %24 : vector<8x256xf32>
    %26 = vector.extract_strided_slice %10 {offsets = [0, 2], sizes = [8, 1], strides = [1, 1]} : vector<8x3xf32> to vector<8x1xf32>
    %27 = vector.broadcast %26 : vector<8x1xf32> to vector<8x256xf32>
    %28 = arith.mulf %25, %27 : vector<8x256xf32>
    %29 = arith.addf %21, %28 : vector<8x256xf32>
    %c0_12 = arith.constant 0 : index
    %c0_13 = arith.constant 0 : index
    %30 = vector.load %arg5[%c0_12, %c0_13] : memref<8x1xf32, #tpu.memory_space<vmem>>, vector<8x1xf32>
    %31 = vector.broadcast %30 : vector<8x1xf32> to vector<8x256xf32>
    %32 = arith.addf %29, %31 : vector<8x256xf32>
    %cst_14 = arith.constant 0.000000e+00 : f32
    %33 = vector.broadcast %cst_14 : f32 to vector<8x256xf32>
    %34 = arith.maximumf %32, %33 : vector<8x256xf32>
    %c0_15 = arith.constant 0 : index
    %c0_16 = arith.constant 0 : index
    %35 = vector.load %arg6[%c0_15, %c0_16] : memref<4x8xbf16, #tpu.memory_space<vmem>>, vector<4x8xbf16>
    %36 = arith.truncf %34 : vector<8x256xf32> to vector<8x256xbf16>
    %cst_17 = arith.constant dense<0.000000e+00> : vector<4x256xf32>
    %37 = tpu.matmul %35, %36, %cst_17 {dimension_numbers = #tpu.dot_dimension_numbers<[1], [0], [0], [1], [0, 0, 1, 1], [], []>} : vector<4x8xbf16>, vector<8x256xbf16>, vector<4x256xf32> -> vector<4x256xf32>
    %c0_18 = arith.constant 0 : index
    %c0_19 = arith.constant 0 : index
    %38 = vector.load %arg7[%c0_18, %c0_19] : memref<4x1xf32, #tpu.memory_space<vmem>>, vector<4x1xf32>
    %39 = vector.broadcast %38 : vector<4x1xf32> to vector<4x256xf32>
    %40 = arith.addf %37, %39 : vector<4x256xf32>
    %c0_20 = arith.constant 0 : index
    %c0_21 = arith.constant 0 : index
    %c0_22 = arith.constant 0 : index
    %41 = vector.load %arg1[%c0_20, %c0_21, %c0_22] : memref<1x4x256xf32, #tpu.memory_space<vmem>>, vector<1x4x256xf32>
    %42 = vector.shape_cast %41 : vector<1x4x256xf32> to vector<4x256xf32>
    %43 = arith.addf %40, %42 : vector<4x256xf32>
    %cst_23 = arith.constant 0.000000e+00 : f32
    %44 = vector.broadcast %cst_23 : f32 to vector<4x256xf32>
    %45 = arith.maximumf %43, %44 : vector<4x256xf32>
    %c0_24 = arith.constant 0 : index
    %c0_25 = arith.constant 0 : index
    %c0_26 = arith.constant 0 : index
    %46 = vector.load %arg9[%c0_24, %c0_25, %c0_26] : memref<1x4x256xf32, #tpu.memory_space<vmem>>, vector<1x4x256xf32>
    %47 = vector.shape_cast %46 : vector<1x4x256xf32> to vector<4x256xf32>
    %48 = vector.shape_cast %45 : vector<4x256xf32> to vector<1x4x256xf32>
    tpu.vector_store %arg9[%c0_24, %c0_25, %c0_26], %48 {strides = array<i32>} : memref<1x4x256xf32, #tpu.memory_space<vmem>>, vector<1x4x256xf32>,
    return
  }
  func.func @transform_0(%arg0: i32) -> (i32, i32, i32) {
    %c0_i32 = arith.constant 0 : i32
    %c0_i32_0 = arith.constant 0 : i32
    %c0_i32_1 = arith.constant 0 : i32
    return %arg0, %c0_i32, %c0_i32_0 : i32, i32, i32
  }
  func.func @transform_1(%arg0: i32) -> (i32, i32) {
    %c0_i32 = arith.constant 0 : i32
    %c0_i32_0 = arith.constant 0 : i32
    %c0_i32_1 = arith.constant 0 : i32
    return %c0_i32, %c0_i32_0 : i32, i32
  }
  func.func @transform_2(%arg0: i32) -> (i32, i32) {
    %c0_i32 = arith.constant 0 : i32
    %c0_i32_0 = arith.constant 0 : i32
    %c0_i32_1 = arith.constant 0 : i32
    return %c0_i32, %c0_i32_0 : i32, i32
  }
  func.func @transform_3(%arg0: i32) -> (i32, i32) {
    %c0_i32 = arith.constant 0 : i32
    %c0_i32_0 = arith.constant 0 : i32
    %c0_i32_1 = arith.constant 0 : i32
    return %c0_i32, %c0_i32_0 : i32, i32
  }
  func.func @transform_4(%arg0: i32) -> (i32, i32) {
    %c0_i32 = arith.constant 0 : i32
    %c0_i32_0 = arith.constant 0 : i32
    %c0_i32_1 = arith.constant 0 : i32
    return %c0_i32, %c0_i32_0 : i32, i32
  }
  func.func @transform_5(%arg0: i32) -> (i32, i32) {
    %c0_i32 = arith.constant 0 : i32
    %c0_i32_0 = arith.constant 0 : i32
    %c0_i32_1 = arith.constant 0 : i32
    return %c0_i32, %c0_i32_0 : i32, i32
  }
  func.func @transform_6(%arg0: i32) -> (i32, i32) {
    %c0_i32 = arith.constant 0 : i32
    %c0_i32_0 = arith.constant 0 : i32
    %c0_i32_1 = arith.constant 0 : i32
    return %c0_i32, %c0_i32_0 : i32, i32
  }
  func.func @transform_7(%arg0: i32) -> (i32, i32) {
    %c0_i32 = arith.constant 0 : i32
    %c0_i32_0 = arith.constant 0 : i32
    %c0_i32_1 = arith.constant 0 : i32
    return %c0_i32, %c0_i32_0 : i32, i32
  }
  func.func @transform_8(%arg0: i32) -> (i32, i32, i32) {
    %c0_i32 = arith.constant 0 : i32
    %c0_i32_0 = arith.constant 0 : i32
    %c0_i32_1 = arith.constant 0 : i32
    return %arg0, %c0_i32, %c0_i32_0 : i32, i32, i32
  }
}

</mosaic_0001>

<bundles_post_ra>
// kernel: sep_temporal_block.1
= control target key start
LH: loop header
LB: loop body
LE: loop exit
PB: predicated region body
PF: predicated region fallthrough
CT: control target
= control target key end

     0   :  { %s673_s27 = smov 0   ;;  %s733_s0 = inlined_call_operand.vmem [shape: f32[2,4,256], index: 0, kind: input, shape index: {}]   ;;  %s734_s1 = inlined_call_operand.vmem [shape: bf16[8,4], index: 1, kind: input, shape index: {}]   ;;  %s735_s2 = inlined_call_operand.vmem [shape: f32[8,1], index: 2, kind: input, shape index: {}]   ;;  %s736_s3 = inlined_call_operand.vmem [shape: f32[8,3], index: 3, kind: input, shape index: {}]   ;;  %s737_s4 = inlined_call_operand.vmem [shape: f32[8,1], index: 4, kind: input, shape index: {}]   ;;  %s738_s5 = inlined_call_operand.vmem [shape: bf16[4,8], index: 5, kind: input, shape index: {}]   ;;  %s739_s6 = inlined_call_operand.vmem [shape: f32[4,1], index: 6, kind: input, shape index: {}]   ;;  %s740_s7 = inlined_call_operand.vmem [shape: f32[3,256], index: 7, kind: input, shape index: {}]   ;;  %s741_s8 = inlined_call_operand.vmem [shape: f32[2,4,256], index: 8, kind: output, shape index: {}]  }
   0x1 LB: > { %s578_s28 = sadd.s32 4294967295, %s621_s27   ;;  %p582_p0 = scmp.ge.s32.totalorder %s621_s27, 1  ;;  %s621_s27 = sphi %s673_s27, %s18_s27  }
   0x2   : > { %p262_p1 = scmp.lt.s32.totalorder %s621_s27, 3 }
   0x4   : > { %p263_p2 = pnand %p582_p0, %p262_p1 }
   0x5   : > { %p296_p3 = scmp.lt.s32.totalorder (!%p263_p2), %s578_s28, 1  ;;  %s626_s19 = smov (!%p263_p2), 16  }
   0x6   : > { %266 = sbr.rel (%p263_p2) target bundleno = 568 (0x238), region = 52  ;;  %s627_s20 = smov (!%p263_p2), 112  }
   0xb   : > { %v623_v0 = vmov 0   ;;  %v314_v1 = vld [vmem:[%s735_s2] sm:$0xff]  ;;  %s743_s28 = smov (!%p296_p3, %s578_s28), 1  ;;  %vm324_vm0 = vcmask 1041408   ;;  %v624_v4 = vmov 1   ;;  %vm320_vm1 = vcmask 31744  }
   0xc   : > { %363 = vmatprep.mubr.bf16.mxu0 %v623_v0  ;;  %609 = vset.pattern.permute.xlu0 %v623_v0  ;;  %v374_v2 = vld [vmem:[%s736_s3] sm:$0xff]  ;;  %s594_s11 = sshll.u32 %s743_s28, 3  ;;  %v625_v10 = vmov 2   ;;  %v386_v23 = vlaneseq  ;;  %vm466_vm4 = vcmask 1043456   ;;  %vm462_vm5 = vcmask 64512  }
   0xd   : > { %317 = vperm.xlu0 %609, %v314_v1   ;;  %611 = vset.pattern.permute.xlu1 %v623_v0  ;;  %s300_s14 = scalar_lea.vmem %s733_s0, %s594_s11  ;;  %v307_v9 = vld [vmem:[%s734_s1] sm:$0xf]  ;;  %s305_s12 = scalar_lea.vmem %s741_s8, %s594_s11 }
   0xe   : > { %406 = vperm.xlu1 %611, %v374_v2   ;;  %505 = vmatprep.mubr.bf16.mxu1 %v623_v0  ;;  %v695_v3 = vld [vmem:[%s300_s14] sm:$0xff]  ;;  %v394_v24 = vshrl.u32 %v386_v23, 7  ;;  %v387_v26 = vand.u32 127, %v386_v23 }
   0xf   : > { %v699_v5 = vcombine.high %v695_v3, %v695_v3  ;;  %v312_v6 = vpack.c.bf16 %v695_v3, %v695_v3  ;;  %v443_v11 = vld [vmem:[%s737_s4] sm:$0xff] }
  0x10   : > { %v456_v21 = vld [vmem:[%s739_s6] sm:$0xf]  ;;  %v395_v27 = vsub.s32 0, %v394_v24  ;;  %v399_v28 = vsub.s32 1, %v394_v24  ;;  %vm388_vm2 = vcmp.lt.s32.totalorder %v387_v26, 16  ;;  %vm417_vm3 = vcmp.lt.s32.totalorder %v387_v26, 112 }
  0x11   : > { %610 = vset.pattern.permute.xlu0 %v624_v4  ;;  %v313_v7 = vpack.c.bf16 %v699_v5, %v699_v5  ;;  %v326_v8 = vsel %vm324_vm0, %v312_v6, 0  ;;  %v391_v29 = vld [vmem:[%s740_s7] ss:$4 sm:$0x3] }
  0x12   : > { %377 = vperm.xlu0 %610, %v374_v2   ;;  %v396_v31 = vrot.slane %v391_v29, %v395_v27  ;;  %v400_v32 = vrot.slane %v391_v29, %v399_v28  ;;  %v589_v34 = vld [vmem:[%s740_s7 + $0x2] ss:$4 sm:$0x3] }
  0x13   : > { %587 = vmatprep.subr.msk.bf16.mxu0 %vm324_vm0, %v313_v7  ;;  %v426_v40 = vrot.slane %v589_v34, %v395_v27  ;;  %v430_v41 = vrot.slane %v589_v34, %v399_v28 }
  0x14   : > { %346 = vmatpush1.bf16.msra.mxu0 %v326_v8 }
  0x16   : > { %612 = vset.pattern.permute.xlu0 %v625_v10 }
  0x17   : > { %588 = vmatmul.mubr.msk.bf16.vlgmr.msra.gmra.mxu0 %vm320_vm1, %v307_v9  ;;  %436 = vperm.xlu0 %612, %v374_v2   ;;  %v453_v2 = vld [vmem:[%s738_s5] sm:$0x3] }
  0x1b   : > { %613 = vset.pattern.permute.xlu0 %v623_v0 }
  0x1c   : > { %446 = vperm.xlu0 %613, %v443_v11  }
  0x88   : > { %v318_v12 = vpop.permute.xlu0 %317 }
  0x89   : > { %v407_v22 = vpop.permute.xlu1 %406 }
  0x8d   : > { %v378_v33 = vpop.permute.xlu0 %377 }
  0x92   : > { %v437_v42 = vpop.permute.xlu0 %436 }
  0x97   : > { %v447_v56 = vpop.permute.xlu0 %446 }
  0xd7   : > { %v365_v13 = vpop.f32.mrf.mxu0 }
  0xd8   : > { %v366_v14 = vadd.f32 %v365_v13, %v318_v12 }
  0xd9   : > { %v367_v15 = vpop.f32.mrf.mxu0 }
  0xda   : > { %v372_v16 = vmax.f32 %v366_v14, 0.0  ;;  %v368_v19 = vadd.f32 %v367_v15, %v318_v12 }
  0xdb   : > { %v369_v17 = vpop.f32.mrf.mxu0 }
  0xdc   : > { %382 = vrot.lane.b32.xlu1 %v372_v16, %s626_s19  ;;  %v373_v20 = vmax.f32 %v368_v19, 0.0  ;;  %v380_v48 = vmul.f32 %v378_v33, %v372_v16 }
  0xdd   : > { %v370_v18 = vpop.f32.mrf.mxu0 }
  0xde   : > { %v381_v49 = vmul.f32 %v378_v33, %v373_v20 }
  0xe0   : > { %413 = vrot.lane.b32.xlu1 %v372_v16, %s627_s20 }
  0xe4   : > { %384 = vrot.lane.b32.xlu1 %v373_v20, %s626_s19 }
  0xe8   : > { %415 = vrot.lane.b32.xlu1 %v373_v20, %s627_s20 }
  0xec   : > { %459 = vperm.xlu1 %611, %v456_v21  }
 0x14e   : > { %v383_v25 = vpop.permute.xlu1 %382 }
 0x152   : > { %v414_v30 = vpop.permute.xlu1 %413 }
 0x156   : > { %v385_v35 = vpop.permute.xlu1 %384 }
 0x157   : > { %v389_v36 = vsel %vm388_vm2, %v383_v25, %v385_v35  ;;  %v390_v37 = vsel %vm388_vm2, %v385_v35, %v383_v25 }
 0x158   : > { %v403_v38 = vmul.f32 %v396_v31, %v390_v37  ;;  %v404_v39 = vmul.f32 %v400_v32, %v389_v36 }
 0x15a   : > { %v409_v43 = vmul.f32 %v407_v22, %v403_v38  ;;  %v410_v44 = vmul.f32 %v407_v22, %v404_v39  ;;  %v416_v45 = vpop.permute.xlu1 %415 }
 0x15b   : > { %v418_v46 = vsel %vm417_vm3, %v414_v30, %v416_v45  ;;  %v419_v47 = vsel %vm417_vm3, %v416_v45, %v414_v30 }
 0x15c   : > { %v433_v50 = vmul.f32 %v426_v40, %v418_v46  ;;  %v434_v51 = vmul.f32 %v430_v41, %v419_v47  ;;  %v411_v54 = vadd.f32 %v409_v43, %v380_v48  ;;  %v412_v55 = vadd.f32 %v410_v44, %v381_v49 }
 0x15e   : > { %v439_v52 = vmul.f32 %v437_v42, %v433_v50  ;;  %v440_v53 = vmul.f32 %v437_v42, %v434_v51 }
 0x160   : > { %v441_v57 = vadd.f32 %v439_v52, %v411_v54  ;;  %v442_v58 = vadd.f32 %v440_v53, %v412_v55 }
 0x162   : > { %v449_v59 = vadd.f32 %v447_v56, %v441_v57  ;;  %v450_v60 = vadd.f32 %v447_v56, %v442_v58 }
 0x164   : > { %v451_v61 = vmax.f32 %v449_v59, 0.0  ;;  %v452_v62 = vmax.f32 %v450_v60, 0.0 }
 0x166   : > { %v454_v63 = vpack.c.bf16 %v451_v61, %v451_v61  ;;  %v455_v0 = vpack.c.bf16 %v452_v62, %v452_v62 }
 0x167   : > { %v460_v4 = vpop.permute.xlu1 %459 }
 0x168   : > { %590 = vmatprep.subr.msk.bf16.mxu1 %vm466_vm4, %v455_v0  ;;  %v468_v1 = vsel %vm466_vm4, %v454_v63, 0 }
 0x169   : > { %488 = vmatpush1.bf16.msra.mxu1 %v468_v1 }
 0x16c   : > { %591 = vmatmul.mubr.msk.bf16.vlgmr.msra.gmra.mxu1 %vm462_vm5, %v453_v2 }
 0x22c   : > { %v507_v6 = vpop.f32.mrf.mxu1 }
 0x22d   : > { %v508_v7 = vadd.f32 %v507_v6, %v460_v4 }
 0x22e   : > { %v509_v8 = vpop.f32.mrf.mxu1 }
 0x22f   : > { %v514_v9 = vadd.f32 %v508_v7, %v695_v3  ;;  %v510_v10 = vadd.f32 %v509_v8, %v460_v4 }
 0x230   : > { %v511_v11 = vpop.f32.mrf.mxu1 }
 0x231   : > { %v515_v12 = vadd.f32 %v510_v10, %v699_v5  ;;  %v516_v14 = vmax.f32 %v514_v9, 0.0 }
 0x232   : > { %v512_v13 = vpop.f32.mrf.mxu1 }
 0x233   : > { %v517_v15 = vmax.f32 %v515_v12, 0.0 }
 0x235   : > { %v520_v16 = vcombine.low %v516_v14, %v517_v15 }
 0x237   : > { %522 = vst [vmem:[%s305_s12] sm:$0xff] %v520_v16 }
 0x238 PF: > { %s18_s27 = sadd.s32 1, %s621_s27  }
 0x239   : > { %p15_p4 = scmp.ge.s32.totalorder %s18_s27, 4  }
 0x23b   :  { %17 = sbr.rel (!%p15_p4) target bundleno = 1 (0x1), region = 83 }

</bundles_post_ra>
